<compile_context>
chip_gen: v7x
topology: tpu7x:2x2x1
jax: 0.10.0
libtpu: 0.0.40
codegen_flags: <defaults>
</compile_context>

<pallas_src>
import jax
import jax.numpy as jnp
from jax.experimental import pallas as pl
from jax.experimental.pallas import tpu as pltpu

_LANES = 128
_SUBLANES = 8


def _mse_partial_kernel(pred_ref, tgt_ref, part_ref):
    """One grid step: squared-error partial sum for a lane-dense tile.

    pred_ref: (tile_rows, 128) f32 VMEM tile of class-0 predictions
    tgt_ref:  (tile_rows, 128) f32 VMEM tile of targets
    part_ref: (1, 8, 128)      f32 per-tile partial sum (one vreg)
    """
    diff = pred_ref[...] - tgt_ref[...]
    sq = diff * diff
    # (tile_rows, 128) -> (tile_rows//8, 8, 128); reducing the leading axis is
    # just vreg + vreg adds on the VPU (no cross-lane work until the wrapper).
    part_ref[...] = jnp.sum(
        sq.reshape(-1, _SUBLANES, _LANES), axis=0
    ).reshape(1, _SUBLANES, _LANES)


def _round_up(x, m):
    return ((x + m - 1) // m) * m


def mse_loss(inputs, targets, *, max_tile_rows=1024):
    """inputs: (B, C) predictions (pre-softmax); targets: (B,) labels."""
    B = inputs.shape[0]

    # Only column 0 is consumed -> slice in the wrapper so the kernel does not
    # stream the other C-1 columns from HBM.  Cast to f32 like the PyTorch op.
    pred = inputs[..., 0].astype(jnp.float32).reshape(-1)   # (B,)
    tgt = targets.astype(jnp.float32).reshape(-1)           # (B,)

    # Lane-dense layout: pad to a whole number of (tile_rows, 128) tiles.
    rows_raw = pl.cdiv(B, _LANES)
    tile_rows = min(max_tile_rows, _round_up(rows_raw, _SUBLANES))
    tile_rows = _round_up(tile_rows, _SUBLANES)
    num_tiles = pl.cdiv(rows_raw, tile_rows)
    rows = num_tiles * tile_rows
    padded = rows * _LANES

    if padded != B:
        pad = padded - B
        # Both operands padded with 0 -> diff = 0 -> no contribution to sum.
        pred = jnp.pad(pred, (0, pad))
        tgt = jnp.pad(tgt, (0, pad))

    pred2d = pred.reshape(rows, _LANES)
    tgt2d = tgt.reshape(rows, _LANES)

    partials = pl.pallas_call(
        _mse_partial_kernel,
        out_shape=jax.ShapeDtypeStruct((num_tiles, _SUBLANES, _LANES), jnp.float32),
        grid=(num_tiles,),
        in_specs=[
            pl.BlockSpec((tile_rows, _LANES), lambda i: (i, 0)),
            pl.BlockSpec((tile_rows, _LANES), lambda i: (i, 0)),
        ],
        out_specs=pl.BlockSpec((1, _SUBLANES, _LANES), lambda i: (i, 0, 0)),
        compiler_params=pltpu.CompilerParams(
            dimension_semantics=("parallel",)  # independent per-tile partials
        ),
    )(pred2d, tgt2d)

    # Tiny tree-reduce of the per-tile partials + fold in 1/B (true batch
    # size, computed at trace time in double precision).
    return jnp.sum(partials) * jnp.float32(1.0 / B)


if __name__ == "__main__":
    key = jax.random.PRNGKey(0)
    k1, k2 = jax.random.split(key)

    B, C = 16, 4  # small shapes: batch=16, num_classes=4
    inputs = jax.random.normal(k1, (B, C), dtype=jnp.float32)
    # ground-truth labels (cast to float inside the loss, as in the PyTorch code)
    targets = jax.random.randint(k2, (B,), 0, C).astype(jnp.float32)

    loss = jax.block_until_ready(mse_loss(inputs, targets))

    # silent sanity check against plain-JAX reference
    ref = jnp.mean(
        (inputs[..., 0].astype(jnp.float32) - targets.astype(jnp.float32)) ** 2
    )
    assert jnp.allclose(loss, ref, rtol=1e-6, atol=1e-6), (loss, ref)

    print("KERNEL_OK")
</pallas_src>

<mosaic_0001>
module attributes {stable_mosaic.version = 11 : i64} {
  func.func @_mse_partial_kernel(%arg0: i32, %arg1: memref<8x128xf32, #tpu.memory_space<vmem>>, %arg2: memref<8x128xf32, #tpu.memory_space<vmem>>, %arg3: memref<1x8x128xf32, #tpu.memory_space<vmem>>) attributes {dimension_semantics = [#tpu.dimension_semantics<parallel>], iteration_bounds = array<i64: 1>, scalar_prefetch = 0 : i64, scratch_operands = 0 : i64, tpu.core_type = #tpu.core_type<tc>, window_params = [{transform_indices = @transform_0, window_bounds = array<i64: 8, 128>}, {transform_indices = @transform_1, window_bounds = array<i64: 8, 128>}, {transform_indices = @transform_2, window_bounds = array<i64: 1, 8, 128>}]} {
    %c0 = arith.constant 0 : index
    %c0_0 = arith.constant 0 : index
    %0 = vector.load %arg1[%c0, %c0_0] : memref<8x128xf32, #tpu.memory_space<vmem>>, vector<8x128xf32>
    %c0_1 = arith.constant 0 : index
    %c0_2 = arith.constant 0 : index
    %1 = vector.load %arg2[%c0_1, %c0_2] : memref<8x128xf32, #tpu.memory_space<vmem>>, vector<8x128xf32>
    %2 = arith.subf %0, %1 : vector<8x128xf32>
    %3 = arith.mulf %2, %2 : vector<8x128xf32>
    %4 = vector.shape_cast %3 : vector<8x128xf32> to vector<1x8x128xf32>
    %cst = arith.constant dense<0.000000e+00> : vector<8x128xf32>
    %5 = vector.multi_reduction <add>, %4, %cst [0] : vector<1x8x128xf32> to vector<8x128xf32>
    %6 = vector.shape_cast %5 : vector<8x128xf32> to vector<1x8x128xf32>
    %c0_3 = arith.constant 0 : index
    %c0_4 = arith.constant 0 : index
    %c0_5 = arith.constant 0 : index
    %7 = vector.load %arg3[%c0_3, %c0_4, %c0_5] : memref<1x8x128xf32, #tpu.memory_space<vmem>>, vector<1x8x128xf32>
    tpu.vector_store %arg3[%c0_3, %c0_4, %c0_5], %6 {strides = array<i32>} : memref<1x8x128xf32, #tpu.memory_space<vmem>>, vector<1x8x128xf32>,
    return
  }
  func.func @transform_0(%arg0: i32) -> (i32, i32) {
    %c0_i32 = arith.constant 0 : i32
    %c0_i32_0 = arith.constant 0 : i32
    return %arg0, %c0_i32 : i32, i32
  }
  func.func @transform_1(%arg0: i32) -> (i32, i32) {
    %c0_i32 = arith.constant 0 : i32
    %c0_i32_0 = arith.constant 0 : i32
    return %arg0, %c0_i32 : i32, i32
  }
  func.func @transform_2(%arg0: i32) -> (i32, i32, i32) {
    %c0_i32 = arith.constant 0 : i32
    %c0_i32_0 = arith.constant 0 : i32
    %c0_i32_1 = arith.constant 0 : i32
    return %arg0, %c0_i32, %c0_i32_0 : i32, i32, i32
  }
}

</mosaic_0001>

<bundles_post_ra>
// kernel: tpu_custom_call.1
= control target key start
LH: loop header
LB: loop body
LE: loop exit
PB: predicated region body
PF: predicated region fallthrough
CT: control target
= control target key end

     0   :  { %7 = vsyncpa [#allocation3], 0  ;;  %s187_s0 = inlined_call_operand.hbm [shape: f32[8,128], index: 0, kind: input, shape index: {}]   ;;  %s188_s1 = inlined_call_operand.hbm [shape: f32[8,128], index: 1, kind: input, shape index: {}]   ;;  %s189_s2 = inlined_call_operand.hbm [shape: f32[1,8,128], index: 2, kind: output, shape index: {}]  }
   0x1   :  { %8 = vsyncpa [#allocation6], 0 }
   0x2   :  { %9 = vsyncpa [#allocation4], 0  ;;  %s133_s9 = smov [#allocation2]   ;;  %s134_s11 = smov [#allocation5]  }
   0x3   :  { %s16_s10 = sshll.u32 %s133_s9, 4  ;;  %s26_s12 = sshll.u32 %s134_s11, 4  ;;  %s17_s10 = int_to_ptr.vmem [resolvable:$true] %s16_s10  ;;  %s27_s12 = int_to_ptr.vmem [resolvable:$true] %s26_s12 }
   0x4   :  { %s61_s15 = scalar_lea.hbm %s187_s0, 128 }
   0x5   :  { %p62_p0 = scmp.ne.s32.totalorder %s187_s0, %s61_s15  ;;  %p65_p1 = scmp.lt.u32.totalorder %s61_s15, %s187_s0 }
   0x7   :  { %p67_p2 = pnand %p65_p1, %p62_p0 }
   0x9   :  { %70 = shalt.err (!%p67_p2)
}
   0xa   :  { %s71_s20 = scalar_lea.vmem %s17_s10, 128  ;;  %p76_p4 = scmp.lt.s32.totalorder %s17_s10, %s17_s10 }
   0xb   :  { %p72_p3 = scmp.ne.s32.totalorder %s17_s10, %s71_s20  ;;  %p77_p5 = scmp.lt.s32.totalorder %s71_s20, %s71_s20 }
   0xd   :  { %p78_p6 = por %p77_p5, %p76_p4 }
   0xf   :  { %p79_p7 = pnand %p78_p6, %p72_p3 }
  0x11   :  { %82 = shalt.err (!%p79_p7)
}
  0x12   :  { %19 = dma.hbm_to_vmem [thread:$0]  %s187_s0, 128, %s17_s10, [#allocation3]  }
  0x13   :  { %s83_s25 = scalar_lea.hbm %s188_s1, 128 }
  0x14   :  { %p84_p8 = scmp.ne.s32.totalorder %s188_s1, %s83_s25  ;;  %p87_p9 = scmp.lt.u32.totalorder %s83_s25, %s188_s1 }
  0x16   :  { %p89_p10 = pnand %p87_p9, %p84_p8 }
  0x18   :  { %92 = shalt.err (!%p89_p10)
}
  0x19   :  { %s93_s30 = scalar_lea.vmem %s27_s12, 128  ;;  %p98_p12 = scmp.lt.s32.totalorder %s27_s12, %s27_s12 }
  0x1a   :  { %p94_p11 = scmp.ne.s32.totalorder %s27_s12, %s93_s30  ;;  %p99_p13 = scmp.lt.s32.totalorder %s93_s30, %s93_s30 }
  0x1c   :  { %p100_p0 = por %p99_p13, %p98_p12 }
  0x1e   :  { %p101_p1 = pnand %p100_p0, %p94_p11 }
  0x20   :  { %104 = shalt.err (!%p101_p1)
}
  0x21   :  { %29 = dma.hbm_to_vmem [thread:$0]  %s188_s1, 128, %s27_s12, [#allocation6]  }
  0x22   :  { %127 = dma.done.wait [#allocation3], 128  }
  0x23   :  { %128 = vsyncadd [#allocation3], 4294967168 }
  0x24   :  { %129 = dma.done.wait [#allocation6], 128  }
  0x25   :  { %130 = vsyncadd [#allocation6], 4294967168  ;;  %v36_v0 = vld [vmem:[#allocation2] sm:$0xff]  ;;  %v37_v1 = vld [vmem:[#allocation5] sm:$0xff]  ;;  %s135_s4 = smov [#allocation7]  }
  0x26   :  { %s48_s5 = sshll.u32 %s135_s4, 4  ;;  %v38_v2 = vsub.f32 %v36_v0, %v37_v1  ;;  %s49_s5 = int_to_ptr.vmem [resolvable:$true] %s48_s5 }
  0x27   :  { %s105_s6 = scalar_lea.vmem %s49_s5, 128  ;;  %p110_p3 = scmp.lt.s32.totalorder %s49_s5, %s49_s5 }
  0x28   :  { %v39_v3 = vmul.f32 %v38_v2, %v38_v2  ;;  %p106_p2 = scmp.ne.s32.totalorder %s49_s5, %s105_s6  ;;  %p111_p4 = scmp.lt.s32.totalorder %s105_s6, %s105_s6 }
  0x2a   :  { %41 = vst [vmem:[#allocation7] sm:$0xff] %v39_v3  ;;  %p112_p5 = por %p111_p4, %p110_p3 }
  0x2c   :  { %p113_p6 = pnand %p112_p5, %p106_p2 }
  0x2e   :  { %116 = shalt.err (!%p113_p6)
}
  0x2f   :  { %s117_s8 = scalar_lea.hbm %s189_s2, 128 }
  0x30   :  { %p118_p7 = scmp.ne.s32.totalorder %s189_s2, %s117_s8  ;;  %p121_p8 = scmp.lt.u32.totalorder %s117_s8, %s189_s2 }
  0x32   :  { %p123_p9 = pnand %p121_p8, %p118_p7 }
  0x34   :  { %126 = shalt.err (!%p123_p9)
}
  0x35   :  { %51 = dma.vmem_to_hbm [thread:$0]  %s49_s5, 128, %s189_s2, [#allocation4]  }
  0x36   :  { %131 = dma.done.wait [#allocation4], 128  }
  0x37   :  { %132 = vsyncadd [#allocation4], 4294967168 }
  0x38   :  { %55 = vsyncpa [#allocation3], 1 }
  0x39   :  { %56 = vsyncpa [#allocation6], 1 }
  0x3a   :  { %57 = vsyncpa [#allocation4], 1 }

</bundles_post_ra>
